<compile_context>
chip_gen: v7x
topology: tpu7x:2x2x1
jax: 0.10.0
libtpu: 0.0.40
codegen_flags: <defaults>
</compile_context>

<pallas_src>
import jax
import jax.numpy as jnp
import numpy as np
from jax.experimental import pallas as pl
from jax.experimental.pallas import tpu as pltpu


# ----------------------------------------------------------------------------
# Kernels
# ----------------------------------------------------------------------------

def _copy_kernel(x_ref, o_ref):
    # Identity tile copy — the entire "compute" of the empty base encoder.
    o_ref[...] = x_ref[...]


def _hbm_copy_kernel(x_hbm, o_hbm, sem):
    # Whole-buffer HBM->HBM DMA: no VMEM round trip for a zero-compute op.
    cp = pltpu.make_async_copy(x_hbm, o_hbm, sem)
    cp.start()
    cp.wait()
    # TODO(synk): for very large tensors, split into a few chunked DMAs
    # (sem array) to overlap issue latency; unnecessary at these sizes.


# ----------------------------------------------------------------------------
# Tiling helpers for the "tiled" scaffold
# ----------------------------------------------------------------------------

# Sublane packing multiple per element size: f32 vreg is [8,128], bf16 [16,128],
# int8/fp8 [32,128].  Matching it keeps the writeback vst unmasked/full-width.
_SUBLANE_MULT = {4: 8, 2: 16, 1: 32}


def _default_tile_bytes() -> int:
    """Per-generation tile size (working set ~4x tile with double buffering)."""
    try:
        kind = jax.devices()[0].device_kind.lower()
    except Exception:
        return 4 * 1024 * 1024
    if "v5 lite" in kind or "v5e" in kind or "v5litepod" in kind:
        # v5e: ~0.8 TB/s HBM, 16 MiB scoped-VMEM default — small tiles are fine.
        return 3 * 1024 * 1024
    # v6e / v7x: faster HBM makes the fixed ~0.35 us per-grid-step cost the tax;
    # 6 MiB tiles keep 4x working set (~24 MiB) under the 32 MiB scoped limit.
    return 6 * 1024 * 1024


def _lane_dense_layout(total_elems: int, itemsize: int, tile_bytes: int):
    """Pick (rows, lanes, tile_rows): lanes a multiple of 128, rows tiled evenly."""
    lanes = None
    for cand in (1024, 512, 256, 128):        # widest lane-dense slab first
        if total_elems % cand == 0:
            lanes = cand
            break
    if lanes is None:
        return None                            # odd sizes: use the DMA path
    rows = total_elems // lanes
    sub = _SUBLANE_MULT.get(itemsize, 8)
    max_rows = max(sub, (tile_bytes // (lanes * itemsize)) // sub * sub)
    if rows <= max_rows:
        return rows, lanes, rows               # single full-extent block
    # Balanced split with an even tile count so v7x's two TensorCores
    # ("parallel" grid axis) each get the same amount of work.
    pairs = -(-rows // (2 * max_rows))         # ceil(rows / (2*max_rows))
    tile_rows = -(-rows // (2 * pairs))        # balance across 2*pairs tiles
    tile_rows = -(-tile_rows // sub) * sub     # round up to the sublane multiple
    tile_rows = min(tile_rows, max_rows)
    return rows, lanes, tile_rows


# ----------------------------------------------------------------------------
# Copy paths
# ----------------------------------------------------------------------------

def _hbm_identity_copy(tensor):
    nbytes = tensor.size * tensor.dtype.itemsize
    return pl.pallas_call(
        _hbm_copy_kernel,
        out_shape=jax.ShapeDtypeStruct(tensor.shape, tensor.dtype),
        in_specs=[pl.BlockSpec(memory_space=pl.ANY)],
        out_specs=pl.BlockSpec(memory_space=pl.ANY),
        scratch_shapes=[pltpu.SemaphoreType.DMA],
        cost_estimate=pl.CostEstimate(
            flops=0, transcendentals=0, bytes_accessed=2 * nbytes),
    )(tensor)


def _tiled_identity_copy(tensor):
    nbytes = tensor.size * tensor.dtype.itemsize
    layout = _lane_dense_layout(tensor.size, tensor.dtype.itemsize,
                                _default_tile_bytes())
    if layout is None:
        # TODO(synk): element counts not divisible by 128 would need masked
        # tail stores in the tiled scaffold; the whole-buffer DMA is exact.
        return _hbm_identity_copy(tensor)

    rows, lanes, tile_rows = layout
    # TODO(synk): subclasses with conv blocks should plumb NCHW -> (N*H*W, C)
    # style lane-dense layout here once, so tiles feed the MXU directly.
    flat = tensor.reshape(rows, lanes)         # lane-dense (>=128-wide) slab

    out_flat = pl.pallas_call(
        _copy_kernel,
        out_shape=jax.ShapeDtypeStruct(flat.shape, flat.dtype),
        grid_spec=pl.GridSpec(
            grid=(pl.cdiv(rows, tile_rows),),
            in_specs=[pl.BlockSpec((tile_rows, lanes), lambda i: (i, 0))],
            out_specs=pl.BlockSpec((tile_rows, lanes), lambda i: (i, 0)),
        ),
        compiler_params=pltpu.CompilerParams(
            # Independent copy tiles: shard across v7x's two TensorCores.
            dimension_semantics=("parallel",),
            # Explicit scoped-VMEM budget, valid on v5e/v6e/v7x alike.
            vmem_limit_bytes=32 * 1024 * 1024,
        ),
        # Pure memory op: help XLA overlap it with neighboring compute.
        cost_estimate=pl.CostEstimate(
            flops=0, transcendentals=0, bytes_accessed=2 * nbytes),
        # NOTE: partial tail tile is correct for a copy (in-bounds rows read
        # real data); compute-bearing subclasses must mask the tail block.
    )(flat)

    return out_flat.reshape(tensor.shape)


# ----------------------------------------------------------------------------
# Module
# ----------------------------------------------------------------------------

class ContentEncoderBase:
    """JAX/Pallas port of hidt ContentEncoderBase (empty ModuleLists).

    copy_mode:
      "identity" (default) — empty module chain == identity, zero HBM traffic.
      "dma"                — materialize a copy via a single HBM->HBM DMA.
      "tiled"              — lane-dense grid-tiled VMEM copy (subclass scaffold).
    """

    def __init__(self, dim: int, copy_mode: str = "identity"):
        # No parameters — the base class only stores output_dim.
        self.output_dim = dim
        assert copy_mode in ("identity", "dma", "tiled")
        self.copy_mode = copy_mode

    def __call__(self, tensor, spade_input=None):
        return self.forward(tensor, spade_input)

    def forward(self, tensor, spade_input=None):
        # spade_input is unused: there are no modules to consume it.
        if self.copy_mode == "identity":
            # Empty module chain == identity: 0 bytes moved, no kernel launch.
            return tensor
        if self.copy_mode == "dma":
            return _hbm_identity_copy(tensor)
        return _tiled_identity_copy(tensor)


if __name__ == "__main__":
    key = jax.random.PRNGKey(0)
    # Small NCHW shape consistent with an image content encoder input.
    x = jax.random.normal(key, (2, 4, 16, 16), dtype=jnp.float32)
    x_host = np.asarray(x)                     # host reference copy

    # Default (recommended) path: pure identity, zero HBM traffic.
    enc_fast = ContentEncoderBase(dim=4)
    y_fast = jax.block_until_ready(enc_fast(x))
    assert y_fast.shape == x.shape and y_fast.dtype == x.dtype
    np.testing.assert_array_equal(np.asarray(y_fast), x_host)

    # HBM->HBM DMA scaffold: no VMEM staging for a zero-compute copy.
    enc_dma = ContentEncoderBase(dim=4, copy_mode="dma")
    y_dma = jax.block_until_ready(enc_dma(x))
    assert y_dma.shape == x.shape and y_dma.dtype == x.dtype
    np.testing.assert_array_equal(np.asarray(y_dma), x_host)

    # Tiled VMEM scaffold (what compute-bearing subclasses will reuse).
    enc_tiled = ContentEncoderBase(dim=4, copy_mode="tiled")
    y_tiled = jax.block_until_ready(enc_tiled(x))
    assert y_tiled.shape == x.shape and y_tiled.dtype == x.dtype
    np.testing.assert_array_equal(np.asarray(y_tiled), x_host)

    # bf16 exercises the dtype-aware sublane rounding in the tiled scaffold.
    xb = x.astype(jnp.bfloat16)
    yb = jax.block_until_ready(enc_tiled(xb))
    assert yb.shape == xb.shape and yb.dtype == xb.dtype
    np.testing.assert_array_equal(np.asarray(yb), np.asarray(xb))

    print("KERNEL_OK")
</pallas_src>

<mosaic_0001>
module attributes {stable_mosaic.version = 11 : i64} {
  func.func @_hbm_copy_kernel(%arg0: memref<2x4x16x16xf32, #tpu.memory_space<any>>, %arg1: memref<2x4x16x16xf32, #tpu.memory_space<any>>, %arg2: memref<!tpu.dma_semaphore, #tpu.memory_space<semaphore_mem>>) attributes {dimension_semantics = [], scalar_prefetch = 0 : i64, scratch_operands = 1 : i64, tpu.core_type = #tpu.core_type<tc>} {
    tpu.enqueue_dma source(%arg0 : memref<2x4x16x16xf32, #tpu.memory_space<any>>) target(%arg1 : memref<2x4x16x16xf32, #tpu.memory_space<any>>) target_semaphore(%arg2 : memref<!tpu.dma_semaphore, #tpu.memory_space<semaphore_mem>>)
    tpu.wait_dma2 semaphore(%arg2 : memref<!tpu.dma_semaphore, #tpu.memory_space<semaphore_mem>>) src(%arg0 : memref<2x4x16x16xf32, #tpu.memory_space<any>>) dst(%arg1 : memref<2x4x16x16xf32, #tpu.memory_space<any>>)
    return
  }
}

</mosaic_0001>

<bundles_post_ra>
// kernel: tpu_custom_call.1
= control target key start
LH: loop header
LB: loop body
LE: loop exit
PB: predicated region body
PF: predicated region fallthrough
CT: control target
= control target key end

     0   :  { %s36_s6 = smov [#allocation2]   ;;  %s37_s7 = smov [#allocation3]   ;;  %s55_s0 = inlined_call_operand.hbm [shape: f32[2,4,16,16], index: 0, kind: input, shape index: {}]   ;;  %s56_s1 = inlined_call_operand.hbm [shape: f32[2,4,16,16], index: 1, kind: output, shape index: {}]  }
   0x1   :  { %s38_s8 = smov 0  }
   0x2   :  { %18 = dma.general %s55_s0, 2048, %s56_s1, %s36_s6, %s37_s7, [#allocation4], %s38_s8, 0  }
   0x3   :  { %34 = dma.done.wait [#allocation2], 2048 }
   0x4   :  { %35 = vsyncadd [#allocation2], 4294965248 }
   0x5   :  { %24 = vsyncmov [#allocation2] }
   0x8   :  { %s25_s13 = vpop.sfrf %24 }
   0x9   :  { %p30_p0 = scmp.ne.s32.totalorder %s25_s13, 0 }
   0xb   :  { %29 = shalt.err (%p30_p0)  }

</bundles_post_ra>
